<compile_context>
chip_gen: v7x
topology: tpu7x:2x2x1
jax: 0.10.0
libtpu: 0.0.40
codegen_flags: <defaults>
</compile_context>

<pallas_src>
import jax
import jax.numpy as jnp
import numpy as np
from jax.experimental import pallas as pl
from jax.experimental.pallas import tpu as pltpu


def add_laplacian_kernel(x_ref, o_ref):
    TN, C, H, W = x_ref.shape

    x = x_ref[...]                                         # (TN, C, H, W)
    s = jnp.sum(x.astype(jnp.float32), axis=1)             # (TN, H, W)

    # 5-point Laplacian with zero-pad boundary: four XLU rotates (positive
    # shifts only) + boundary masks on the VPU. Rolls wrap, so zero out the
    # wrapped boundary row/column of each contribution.
    row = jax.lax.broadcasted_iota(jnp.int32, (TN, H, W), 1)
    col = jax.lax.broadcasted_iota(jnp.int32, (TN, H, W), 2)
    zero = jnp.float32(0.0)

    up = jnp.where(row == 0, zero, pltpu.roll(s, 1, axis=1))          # s[i-1, j]
    down = jnp.where(row == H - 1, zero, pltpu.roll(s, H - 1, axis=1))  # s[i+1, j]
    left = jnp.where(col == 0, zero, pltpu.roll(s, 1, axis=2))        # s[i, j-1]
    right = jnp.where(col == W - 1, zero, pltpu.roll(s, W - 1, axis=2))  # s[i, j+1]

    lap = up + down + left + right - 4.0 * s               # (TN, H, W), exact f32

    # Fused concat: first C channels are a straight copy, last channel is Lap.
    o_ref[:, 0:C, :, :] = x.astype(o_ref.dtype)
    o_ref[:, C:C + 1, :, :] = lap[:, None, :, :].astype(o_ref.dtype)


def _pick_batch_tile(n, per_img_bytes, budget_bytes, min_steps=2):
    """Largest TN dividing n with TN*per_img <= budget and >= min_steps grid steps."""
    best = 1
    for cand in range(1, n + 1):
        if n % cand:
            continue
        if cand * per_img_bytes > budget_bytes:
            continue
        if n > 1 and n // cand < min_steps:
            continue  # keep >=2 steps so both v7x TensorCores get work
        best = cand
    return best


def add_laplacian(x, *, block_budget_bytes=2 << 20):
    """x: (N, 3, H, W) float32 (NCHW, as the torch module sees it)."""
    N, C, H, W = x.shape
    itemsize = jnp.dtype(x.dtype).itemsize
    per_img = (2 * C + 1) * H * W * itemsize       # HBM bytes (in + out) per image
    tn = _pick_batch_tile(N, per_img, block_budget_bytes)
    # Double-buffered in+out block stays <= ~2 * block_budget (<= 4 MiB here),
    # well under the default scoped VMEM on v5e (16 MiB) / v6e / v7x (32 MiB),
    # so no vmem_limit_bytes override is needed.

    return pl.pallas_call(
        add_laplacian_kernel,
        out_shape=jax.ShapeDtypeStruct((N, C + 1, H, W), x.dtype),
        grid=(N // tn,),
        in_specs=[pl.BlockSpec((tn, C, H, W), lambda n: (n, 0, 0, 0))],
        out_specs=pl.BlockSpec((tn, C + 1, H, W), lambda n: (n, 0, 0, 0)),
        compiler_params=pltpu.CompilerParams(
            dimension_semantics=("parallel",)),
    )(x)


# ---------------- pure-JAX reference (independent correctness check) --------
def _ref_add_laplacian(x):
    s = jnp.sum(x, axis=1)                                 # (N, H, W)
    sp = jnp.pad(s, ((0, 0), (1, 1), (1, 1)))
    lap = (sp[:, :-2, 1:-1] + sp[:, 2:, 1:-1]
           + sp[:, 1:-1, :-2] + sp[:, 1:-1, 2:] - 4.0 * s)
    return jnp.concatenate([x, lap[:, None, :, :]], axis=1)


if __name__ == "__main__":
    key = jax.random.PRNGKey(0)
    # Module implies 3 input channels; W=128 exercises the lane-dense store
    # path, N=8 exercises multi-image blocks with a >=2-step parallel grid.
    N, C, H, W = 8, 3, 16, 128
    x = jax.random.normal(key, (N, C, H, W), jnp.float32)

    out = jax.block_until_ready(add_laplacian(x))
    ref = jax.block_until_ready(_ref_add_laplacian(x))

    # Roll-based stencil is exact f32 (no MXU bf16 rounding), so the
    # tolerance can be tight.
    np.testing.assert_allclose(np.asarray(out), np.asarray(ref),
                               rtol=1e-6, atol=1e-5)
    print("KERNEL_OK")
</pallas_src>

<mosaic_0001>
module attributes {stable_mosaic.version = 11 : i64} {
  func.func @add_laplacian_kernel(%arg0: i32, %arg1: memref<4x3x16x128xf32, #tpu.memory_space<vmem>>, %arg2: memref<4x4x16x128xf32, #tpu.memory_space<vmem>>) attributes {dimension_semantics = [#tpu.dimension_semantics<parallel>], iteration_bounds = array<i64: 2>, scalar_prefetch = 0 : i64, scratch_operands = 0 : i64, tpu.core_type = #tpu.core_type<tc>, window_params = [{transform_indices = @transform_0, window_bounds = array<i64: 4, 3, 16, 128>}, {transform_indices = @transform_1, window_bounds = array<i64: 4, 4, 16, 128>}]} {
    %c0 = arith.constant 0 : index
    %c0_0 = arith.constant 0 : index
    %c0_1 = arith.constant 0 : index
    %c0_2 = arith.constant 0 : index
    %0 = vector.load %arg1[%c0, %c0_0, %c0_1, %c0_2] : memref<4x3x16x128xf32, #tpu.memory_space<vmem>>, vector<4x3x16x128xf32>
    %cst = arith.constant dense<0.000000e+00> : vector<4x16x128xf32>
    %1 = vector.multi_reduction <add>, %0, %cst [1] : vector<4x3x16x128xf32> to vector<4x16x128xf32>
    %2 = tpu.iota {dimensions = array<i32: 1>} : vector<4x16x128xi32>
    %3 = tpu.iota {dimensions = array<i32: 2>} : vector<4x16x128xi32>
    %c0_i32 = arith.constant 0 : i32
    %4 = vector.broadcast %c0_i32 : i32 to vector<4x16x128xi32>
    %5 = arith.cmpi eq, %2, %4 : vector<4x16x128xi32>
    %c1_i32 = arith.constant 1 : i32
    %6 = tpu.dynamic_rotate %1 by %c1_i32 dim 1 : vector<4x16x128xf32>, i32 -> vector<4x16x128xf32>
    %cst_3 = arith.constant 0.000000e+00 : f32
    %7 = vector.broadcast %cst_3 : f32 to vector<4x16x128xf32>
    %8 = arith.select %5, %7, %6 : vector<4x16x128xi1>, vector<4x16x128xf32>
    %c15_i32 = arith.constant 15 : i32
    %9 = vector.broadcast %c15_i32 : i32 to vector<4x16x128xi32>
    %10 = arith.cmpi eq, %2, %9 : vector<4x16x128xi32>
    %c15_i32_4 = arith.constant 15 : i32
    %11 = tpu.dynamic_rotate %1 by %c15_i32_4 dim 1 : vector<4x16x128xf32>, i32 -> vector<4x16x128xf32>
    %cst_5 = arith.constant 0.000000e+00 : f32
    %12 = vector.broadcast %cst_5 : f32 to vector<4x16x128xf32>
    %13 = arith.select %10, %12, %11 : vector<4x16x128xi1>, vector<4x16x128xf32>
    %c0_i32_6 = arith.constant 0 : i32
    %14 = vector.broadcast %c0_i32_6 : i32 to vector<4x16x128xi32>
    %15 = arith.cmpi eq, %3, %14 : vector<4x16x128xi32>
    %c1_i32_7 = arith.constant 1 : i32
    %16 = tpu.dynamic_rotate %1 by %c1_i32_7 dim 2 : vector<4x16x128xf32>, i32 -> vector<4x16x128xf32>
    %cst_8 = arith.constant 0.000000e+00 : f32
    %17 = vector.broadcast %cst_8 : f32 to vector<4x16x128xf32>
    %18 = arith.select %15, %17, %16 : vector<4x16x128xi1>, vector<4x16x128xf32>
    %c127_i32 = arith.constant 127 : i32
    %19 = vector.broadcast %c127_i32 : i32 to vector<4x16x128xi32>
    %20 = arith.cmpi eq, %3, %19 : vector<4x16x128xi32>
    %c127_i32_9 = arith.constant 127 : i32
    %21 = tpu.dynamic_rotate %1 by %c127_i32_9 dim 2 : vector<4x16x128xf32>, i32 -> vector<4x16x128xf32>
    %cst_10 = arith.constant 0.000000e+00 : f32
    %22 = vector.broadcast %cst_10 : f32 to vector<4x16x128xf32>
    %23 = arith.select %20, %22, %21 : vector<4x16x128xi1>, vector<4x16x128xf32>
    %24 = arith.addf %8, %13 : vector<4x16x128xf32>
    %25 = arith.addf %24, %18 : vector<4x16x128xf32>
    %26 = arith.addf %25, %23 : vector<4x16x128xf32>
    %cst_11 = arith.constant 4.000000e+00 : f32
    %27 = vector.broadcast %cst_11 : f32 to vector<4x16x128xf32>
    %28 = arith.mulf %27, %1 : vector<4x16x128xf32>
    %29 = arith.subf %26, %28 : vector<4x16x128xf32>
    %c0_12 = arith.constant 0 : index
    %c0_13 = arith.constant 0 : index
    %c0_14 = arith.constant 0 : index
    %c0_15 = arith.constant 0 : index
    %30 = vector.load %arg2[%c0_12, %c0_13, %c0_14, %c0_15] : memref<4x4x16x128xf32, #tpu.memory_space<vmem>>, vector<4x3x16x128xf32>
    tpu.vector_store %arg2[%c0_12, %c0_13, %c0_14, %c0_15], %0 {strides = array<i32>} : memref<4x4x16x128xf32, #tpu.memory_space<vmem>>, vector<4x3x16x128xf32>,
    %31 = vector.shape_cast %29 : vector<4x16x128xf32> to vector<4x1x16x128xf32>
    %c0_16 = arith.constant 0 : index
    %c3 = arith.constant 3 : index
    %c0_17 = arith.constant 0 : index
    %c0_18 = arith.constant 0 : index
    %32 = vector.load %arg2[%c0_16, %c3, %c0_17, %c0_18] : memref<4x4x16x128xf32, #tpu.memory_space<vmem>>, vector<4x1x16x128xf32>
    tpu.vector_store %arg2[%c0_16, %c3, %c0_17, %c0_18], %31 {strides = array<i32>} : memref<4x4x16x128xf32, #tpu.memory_space<vmem>>, vector<4x1x16x128xf32>,
    return
  }
  func.func @transform_0(%arg0: i32) -> (i32, i32, i32, i32) {
    %c0_i32 = arith.constant 0 : i32
    %c0_i32_0 = arith.constant 0 : i32
    %c0_i32_1 = arith.constant 0 : i32
    %c0_i32_2 = arith.constant 0 : i32
    return %arg0, %c0_i32, %c0_i32_0, %c0_i32_1 : i32, i32, i32, i32
  }
  func.func @transform_1(%arg0: i32) -> (i32, i32, i32, i32) {
    %c0_i32 = arith.constant 0 : i32
    %c0_i32_0 = arith.constant 0 : i32
    %c0_i32_1 = arith.constant 0 : i32
    %c0_i32_2 = arith.constant 0 : i32
    return %arg0, %c0_i32, %c0_i32_0, %c0_i32_1 : i32, i32, i32, i32
  }
}

</mosaic_0001>

<bundles_post_ra>
// kernel: tpu_custom_call.1
= control target key start
LH: loop header
LB: loop body
LE: loop exit
PB: predicated region body
PF: predicated region fallthrough
CT: control target
= control target key end

     0   :  { %6 = vsyncpa [#allocation3], 0  ;;  %s1035_s0 = inlined_call_operand.hbm [shape: f32[8,3,16,128], index: 0, kind: input, shape index: {}]   ;;  %s1036_s1 = inlined_call_operand.hbm [shape: f32[8,4,16,128], index: 1, kind: output, shape index: {}]  }
   0x1   :  { %8 = vsyncpa [#allocation3 + $0x1], 0 }
   0x2   :  { %9 = vsyncpa [#allocation4], 0 }
   0x3   :  { %11 = vsyncpa [#allocation4 + $0x1], 0  ;;  %s643_s6 = smov 0   ;;  %s645_s7 = smov 0  }
   0x4   :  { %s647_s8 = smov 0   ;;  %s649_s9 = smov 0  }
   0x5 LB: > { %s664_s10 = sadd.s32 4294967295, %s623_s9   ;;  %s448_s11 = sadd.s32 4294967294, %s623_s9   ;;  %s623_s9 = sphi %s649_s9, %s1048_s9   ;;  %s619_s8 = sphi %s647_s8, %s1047_s8   ;;  %s615_s7 = sphi %s645_s7, %s1046_s7   ;;  %s611_s6 = sphi %s643_s6, %s1045_s6  }
   0x6   : > { %s668_s12 = sadd.s32 1, %s623_s9   ;;  %s24_s13 = sadd.s32 1, %s619_s8 }
   0x7   : > { %s21_s14 = ssub.s32 %s623_s9, %s668_s12  ;;  %p31_p0 = scmp.ne.s32.totalorder %s619_s8, %s615_s7 }
   0x8   : > { %p22_p1 = scmp.eq.s32.totalorder %s21_s14, 0  ;;  %p32_p2 = scmp.eq.s32.totalorder %s623_s9, 0 }
   0x9   : > { %p37_p3 = scmp.ne.s32.totalorder %s615_s7, %s611_s6  ;;  %p38_p4 = scmp.eq.s32.totalorder %s664_s10, 0 }
   0xa   : > { %s680_s15 = scalar_select %p22_p1, %s619_s8, %s24_s13  }
   0xb   : > { %p33_p5 = por %p32_p2, %p31_p0  ;;  %p682_p6 = por %p38_p4, %p37_p3 }
   0xc   : > { %p61_p7 = scmp.eq.s32.totalorder %s664_s10, 1  ;;  %p67_p8 = scmp.eq.s32.totalorder %s448_s11, 1 }
   0xd   : > { %p487_p10 = scmp.lt.s32.totalorder %s623_s9, 2  ;;  %s87_s19 = sand.u32 1, %s619_s8  }
   0xe   : > { %p689_p11 = por %p61_p7, %p31_p0  ;;  %p693_p12 = por %p67_p8, %p37_p3 }
   0xf   : > { %s473_s20 = smul.u32 3072, %s623_s9  ;;  %p704_p13 = pnand %p487_p10, %p33_p5 }
  0x10   : > { %s1039_s17 = scalar_select %p689_p11, 1, 0 }
  0x11   : > { %s1040_s18 = scalar_select %p693_p12, 1, 0 }
  0x12   : > { %s472_s21 = smul.u32 192, %s87_s19  ;;  %s702_s24 = scalar_lea.hbm %s1035_s0, %s473_s20 }
  0x13   : > { %s710_s28 = scalar_lea.sflag [#allocation3], %s87_s19  ;;  %s527_s29 = scalar_lea.hbm %s702_s24, 3072 }
  0x14   : > { %s91_s26 = scalar_lea.vmem [#allocation2], %s472_s21  ;;  %p528_p0 = scmp.ne.s32.totalorder %s702_s24, %s527_s29 }
  0x15   : > { %s99_s27 = sshll.u32 %s91_s26, 4  ;;  %p529_p1 = pneg %p704_p13  ;;  %s708_s27 = int_to_ptr.vmem [resolvable:$true] %s99_s27 }
  0x16   : > { %s532_s3 = scalar_lea.hbm %s1035_s0, 6144  ;;  %p533_p4 = scmp.lt.u32.totalorder %s702_s24, %s1035_s0 }
  0x17   : > { %p530_p2 = pnand %p529_p1, %p528_p0  ;;  %p534_p5 = scmp.lt.u32.totalorder %s532_s3, %s527_s29 }
  0x18   : > { %p536_p8 = scmp.lt.u32.totalorder %s527_s29, %s702_s24 }
  0x19   : > { %p531_p3 = pneg %p530_p2  ;;  %p535_p7 = por %p534_p5, %p533_p4 }
  0x1b   : > { %p537_p10 = por %p536_p8, %p535_p7 }
  0x1d   : > { %p538_p9 = pnand %p537_p10, %p531_p3 }
  0x1f   : > { %541 = shalt.err (!%p538_p9)
}
  0x20   : > { %s542_s11 = scalar_lea.vmem %s708_s27, 3072  ;;  %s625_s13 = smov [#allocation2]  }
  0x21   : > { %p543_p0 = scmp.ne.s32.totalorder %s708_s27, %s542_s11  ;;  %s547_s14 = sshll.u32 %s625_s13, 4  ;;  %s548_s14 = int_to_ptr.vmem [resolvable:$false] %s547_s14 }
  0x22   : > { %s549_s19 = scalar_lea.vmem %s548_s14, 6144  ;;  %p550_p11 = scmp.lt.s32.totalorder %s708_s27, %s548_s14 }
  0x23   : > { %p545_p2 = pnand %p543_p0, %p529_p1  ;;  %p551_p4 = scmp.lt.s32.totalorder %s549_s19, %s542_s11 }
  0x25   : > { %p546_p12 = pneg %p545_p2  ;;  %p552_p5 = por %p551_p4, %p550_p11 }
  0x27   : > { %p553_p7 = pnand %p552_p5, %p546_p12 }
  0x29   : > { %556 = shalt.err (!%p553_p7)
}
  0x2a   : > { %s626_s20 = smov 128   ;;  %s627_s21 = smov 8  }
  0x2b   : > { %482 = dma.hbm_to_vmem [thread:$0]  (!%p704_p13), %s702_s24, 3072, %s708_s27, %s710_s28, %s626_s20, %s626_s20, %s627_s21  }
  0x2c   : > { %p454_p9 = scmp.ge.s32.totalorder %s623_s9, 1  ;;  %p107_p1 = scmp.lt.s32.totalorder %s623_s9, 3 }
  0x2e   : > { %p108_p3 = pnand %p454_p9, %p107_p1 }
  0x2f   : > { %s741_s22 = sand.u32 (!%p108_p3), 1, %s615_s7  }
  0x30   : > { %111 = sbr.rel (%p108_p3) target bundleno = 228 (0xe4), region = 24  ;;  %s114_s26 = scalar_lea.sflag (!%p108_p3), [#allocation3], %s741_s22 }
  0x31   : > { %s474_s23 = smul.u32 (!%p108_p3), 192, %s741_s22 }
  0x33   : > { %s745_s29 = scalar_lea.vmem (!%p108_p3), [#allocation2], %s474_s23 }
  0x37   : > { %602 = dma.done.wait (%p682_p6), %s114_s26, 3072  }
  0x38   : > { %604 = vsyncadd (%p682_p6), %s114_s26, 4294964224  ;;  %v178_v0 = vlaneseq  ;;  %s455_s24 = sshll.u32 %s741_s22, 8  ;;  %v144_v2 = vld [vmem:[%s745_s29 + $0x30] sm:$0xff]  ;;  %v146_v3 = vld [vmem:[%s745_s29 + $0x40] sm:$0xff]  ;;  %s628_s25 = smov 1  }
  0x39   : > { %v148_v4 = vld [vmem:[%s745_s29 + $0x50] sm:$0xff]  ;;  %v166_v6 = vadd.f32 %v146_v3, %v144_v2  ;;  %s761_s16 = scalar_lea.vmem [#allocation5], %s455_s24  ;;  %v138_v7 = vld [vmem:[%s745_s29] sm:$0xff]  ;;  %v145_v11 = vld [vmem:[%s745_s29 + $0x38] sm:$0xff]  ;;  %s629_s27 = smov 127  }
  0x3a   : > { %v753_v1 = vshrl.u32 %v178_v0, 7  ;;  %333 = vst [vmem:[%s761_s16 + $0x40] sm:$0xff] %v144_v2  ;;  %335 = vst [vmem:[%s761_s16 + $0x50] sm:$0xff] %v146_v3  ;;  %v140_v8 = vld [vmem:[%s745_s29 + $0x10] sm:$0xff]  ;;  %v142_v9 = vld [vmem:[%s745_s29 + $0x20] sm:$0xff]  ;;  %s471_s28 = sshll.u32 %s664_s10, 12 }
  0x3b   : > { %337 = vst [vmem:[%s761_s16 + $0x60] sm:$0xff] %v148_v4  ;;  %v162_v10 = vadd.f32 %v140_v8, %v138_v7  ;;  %327 = vst [vmem:[%s761_s16] sm:$0xff] %v138_v7  ;;  %v147_v12 = vld [vmem:[%s745_s29 + $0x48] sm:$0xff]  ;;  %v149_v13 = vld [vmem:[%s745_s29 + $0x58] sm:$0xff]  ;;  %v775_v14 = vadd.f32 %v166_v6, %v148_v4  ;;  %s375_s30 = sshll.u32 %s761_s16, 4  ;;  %s987_s4 = scalar_lea.hbm %s1036_s1, %s471_s28  ;;  %s989_s30 = int_to_ptr.vmem [resolvable:$true] %s375_s30 }
  0x3c   : > { %v759_v5 = vadd.s32 8, %v753_v1  ;;  %329 = vst [vmem:[%s761_s16 + $0x10] sm:$0xff] %v140_v8  ;;  %331 = vst [vmem:[%s761_s16 + $0x20] sm:$0xff] %v142_v9  ;;  %v168_v15 = vadd.f32 %v147_v12, %v145_v11  ;;  %v139_v16 = vld [vmem:[%s745_s29 + $0x8] sm:$0xff]  ;;  %v141_v17 = vld [vmem:[%s745_s29 + $0x18] sm:$0xff]  ;;  %vm183_vm0 = vcmp.eq.s32.totalorder %v753_v1, 0 }
  0x3d   : > { %334 = vst [vmem:[%s761_s16 + $0x48] sm:$0xff] %v145_v11  ;;  %336 = vst [vmem:[%s761_s16 + $0x58] sm:$0xff] %v147_v12  ;;  %v143_v18 = vld [vmem:[%s745_s29 + $0x28] sm:$0xff]  ;;  %vm193_vm1 = vcmp.lt.s32.totalorder %v753_v1, 1  ;;  %v785_v19 = vadd.f32 %v162_v10, %v142_v9  ;;  %v164_v20 = vadd.f32 %v141_v17, %v139_v16  ;;  %v153_v22 = vld [vmem:[%s745_s29 + $0x78] sm:$0xff]  ;;  %vm220_vm2 = vcmp.lt.s32.totalorder %v753_v1, 7 }
  0x3e   : > { %338 = vst [vmem:[%s761_s16 + $0x68] sm:$0xff] %v149_v13  ;;  %328 = vst [vmem:[%s761_s16 + $0x8] sm:$0xff] %v139_v16  ;;  %v151_v21 = vld [vmem:[%s745_s29 + $0x68] sm:$0xff]  ;;  %vm211_vm3 = vcmp.eq.s32.totalorder %v759_v5, 15  ;;  %242 = vrot.lane.b32.xlu1 %v775_v14, %s628_s25  ;;  %v797_v24 = vadd.f32 %v168_v15, %v149_v13  ;;  %v186_v29 = vrot.slane %v775_v14, 7  ;;  %v213_v30 = vrot.slane %v775_v14, 1 }
  0x3f   : > { %330 = vst [vmem:[%s761_s16 + $0x18] sm:$0xff] %v141_v17  ;;  %332 = vst [vmem:[%s761_s16 + $0x28] sm:$0xff] %v143_v18  ;;  %v155_v23 = vld [vmem:[%s745_s29 + $0x88] sm:$0xff]  ;;  %v172_v25 = vadd.f32 %v153_v22, %v151_v21  ;;  %v150_v26 = vld [vmem:[%s745_s29 + $0x60] sm:$0xff]  ;;  %v809_v31 = vadd.f32 %v164_v20, %v143_v18  ;;  %v185_v36 = vrot.slane %v785_v19, 7  ;;  %v212_v37 = vrot.slane %v785_v19, 1 }
  0x40   : > { %340 = vst [vmem:[%s761_s16 + $0x88] sm:$0xff] %v151_v21  ;;  %342 = vst [vmem:[%s761_s16 + $0x98] sm:$0xff] %v153_v22  ;;  %v152_v27 = vld [vmem:[%s745_s29 + $0x70] sm:$0xff]  ;;  %v154_v28 = vld [vmem:[%s745_s29 + $0x80] sm:$0xff]  ;;  %v190_v43 = vrot.slane %v797_v24, 7  ;;  %v217_v44 = vrot.slane %v797_v24, 1 }
  0x41   : > { %344 = vst [vmem:[%s761_s16 + $0xa8] sm:$0xff] %v155_v23  ;;  %238 = vrot.lane.b32.xlu0 %v785_v19, %s628_s25  ;;  %v170_v32 = vadd.f32 %v152_v27, %v150_v26  ;;  %339 = vst [vmem:[%s761_s16 + $0x80] sm:$0xff] %v150_v26  ;;  %v157_v33 = vld [vmem:[%s745_s29 + $0x98] sm:$0xff]  ;;  %v819_v38 = vadd.f32 %v172_v25, %v155_v23  ;;  %v189_v47 = vrot.slane %v809_v31, 7  ;;  %v216_v48 = vrot.slane %v809_v31, 1  ;;  %s361_s10 = scalar_lea.sflag [#allocation4], %s741_s22 }
  0x42   : > { %341 = vst [vmem:[%s761_s16 + $0x90] sm:$0xff] %v152_v27  ;;  %343 = vst [vmem:[%s761_s16 + $0xa0] sm:$0xff] %v154_v28  ;;  %v159_v34 = vld [vmem:[%s745_s29 + $0xa8] sm:$0xff]  ;;  %v161_v35 = vld [vmem:[%s745_s29 + $0xb8] sm:$0xff]  ;;  %v199_v50 = vsel %vm193_vm1, %v190_v43, %v186_v29  ;;  %v222_v51 = vsel %vm220_vm2, %v213_v30, %v217_v44  ;;  %v195_v52 = vsel %vm193_vm1, %v186_v29, %v190_v43  ;;  %s557_s5 = scalar_lea.vmem %s989_s30, 4096  ;;  %p1042_p11 = scmp.ne.s32.totalorder %s1039_s17, 0 }
  0x43   : > { %v176_v39 = vadd.f32 %v159_v34, %v157_v33  ;;  %346 = vst [vmem:[%s761_s16 + $0xc8] sm:$0xff] %v157_v33  ;;  %348 = vst [vmem:[%s761_s16 + $0xd8] sm:$0xff] %v159_v34  ;;  %v156_v40 = vld [vmem:[%s745_s29 + $0x90] sm:$0xff]  ;;  %v158_v41 = vld [vmem:[%s745_s29 + $0xa0] sm:$0xff]  ;;  %v829_v45 = vadd.f32 %v170_v32, %v154_v28  ;;  %v204_v54 = vsel %vm183_vm0, 0.0, %v199_v50  ;;  %v198_v55 = vsel %vm193_vm1, %v189_v47, %v185_v36  ;;  %p558_p6 = scmp.ne.s32.totalorder %s989_s30, %s557_s5  ;;  %s630_s11 = smov [#allocation5]  }
  0x44   : > { %350 = vst [vmem:[%s761_s16 + $0xe8] sm:$0xff] %v161_v35  ;;  %v160_v42 = vld [vmem:[%s745_s29 + $0xb0] sm:$0xff]  ;;  %v174_v46 = vadd.f32 %v158_v41, %v156_v40  ;;  %345 = vst [vmem:[%s761_s16 + $0xc0] sm:$0xff] %v156_v40  ;;  %244 = vrot.lane.b32.xlu1 %v797_v24, %s628_s25  ;;  %v221_v56 = vsel %vm220_vm2, %v212_v37, %v216_v48  ;;  %v856_v57 = vadd.f32 %v222_v51, %v204_v54  ;;  %s561_s13 = sshll.u32 %s630_s11, 4  ;;  %s562_s13 = int_to_ptr.vmem [resolvable:$false] %s561_s13 }
  0x45   : > { %347 = vst [vmem:[%s761_s16 + $0xd0] sm:$0xff] %v158_v41  ;;  %349 = vst [vmem:[%s761_s16 + $0xe0] sm:$0xff] %v160_v42  ;;  %v838_v49 = vadd.f32 %v176_v39, %v161_v35  ;;  %240 = vrot.lane.b32.xlu0 %v809_v31, %s628_s25  ;;  %v202_v58 = vsel %vm183_vm0, 0.0, %v198_v55  ;;  %v226_v59 = vsel %vm220_vm2, %v217_v44, %v213_v30  ;;  %v187_v2 = vrot.slane %v829_v45, 7  ;;  %p559_p12 = pnand %p558_p6, %p1042_p11  ;;  %s563_s14 = scalar_lea.vmem %s562_s13, 8192 }
  0x46   : > { %v848_v53 = vadd.f32 %v174_v46, %v160_v42  ;;  %v194_v60 = vsel %vm193_vm1, %v185_v36, %v189_v47  ;;  %v287_v61 = vadd.f32 %v221_v56, %v202_v58  ;;  %v232_v62 = vsel %vm211_vm3, 0.0, %v226_v59  ;;  %p564_p8 = scmp.lt.s32.totalorder %s989_s30, %s562_s13  ;;  %p565_p10 = scmp.lt.s32.totalorder %s563_s14, %s557_s5 }
  0x47   : > { %v225_v63 = vsel %vm220_vm2, %v216_v48, %v212_v37  ;;  %v871_v3 = vadd.f32 %v232_v62, %v195_v52  ;;  %v191_v6 = vrot.slane %v819_v38, 7  ;;  %v214_v7 = vrot.slane %v829_v45, 1  ;;  %p560_p13 = pneg %p559_p12 }
  0x48   : > { %248 = vrot.lane.b32.xlu1 %v819_v38, %s628_s25  ;;  %v230_v4 = vsel %vm211_vm3, 0.0, %v225_v63  ;;  %v218_v9 = vrot.slane %v819_v38, 1  ;;  %v188_v10 = vrot.slane %v848_v53, 7  ;;  %v192_v11 = vrot.slane %v838_v49, 7  ;;  %p566_p0 = por %p565_p10, %p564_p8 }
  0x49   : > { %246 = vrot.lane.b32.xlu0 %v829_v45, %s628_s25  ;;  %v288_v8 = vadd.f32 %v230_v4, %v194_v60  ;;  %v196_v12 = vsel %vm193_vm1, %v187_v2, %v191_v6  ;;  %v200_v13 = vsel %vm193_vm1, %v191_v6, %v187_v2  ;;  %v215_v15 = vrot.slane %v848_v53, 1 }
  0x4a   : > { %v219_v16 = vrot.slane %v838_v49, 1  ;;  %v227_v17 = vsel %vm220_vm2, %v218_v9, %v214_v7  ;;  %v206_v18 = vsel %vm183_vm0, 0.0, %v200_v13  ;;  %v223_v20 = vsel %vm220_vm2, %v214_v7, %v218_v9  ;;  %p567_p2 = pnand %p566_p0, %p560_p13 }
  0x4b   : > { %v197_v21 = vsel %vm193_vm1, %v188_v10, %v192_v11  ;;  %v234_v22 = vsel %vm211_vm3, 0.0, %v227_v17  ;;  %v900_v23 = vadd.f32 %v223_v20, %v206_v18  ;;  %v201_v26 = vsel %vm193_vm1, %v192_v11, %v188_v10 }
  0x4c   : > { %252 = vrot.lane.b32.xlu1 %v838_v49, %s628_s25  ;;  %v228_v25 = vsel %vm220_vm2, %v219_v16, %v215_v15  ;;  %v292_v27 = vadd.f32 %v234_v22, %v196_v12  ;;  %v208_v29 = vsel %vm183_vm0, 0.0, %v201_v26  ;;  %v224_v30 = vsel %vm220_vm2, %v215_v15, %v219_v16 }
  0x4d   : > { %250 = vrot.lane.b32.xlu0 %v848_v53, %s628_s25  ;;  %v236_v28 = vsel %vm211_vm3, 0.0, %v228_v25  ;;  %v916_v33 = vadd.f32 %v224_v30, %v208_v29  ;;  %v927_v36 = vand.u32 127, %v178_v0  ;;  %v312_v47 = vmul.f32 4.0, %v809_v31 }
  0x4e   : > { %v914_v32 = vadd.f32 %v236_v28, %v197_v21  ;;  %v311_v52 = vmul.f32 4.0, %v785_v19  ;;  %v314_v60 = vmul.f32 4.0, %v797_v24  ;;  %v313_v62 = vmul.f32 4.0, %v775_v14 }
  0x4f   : > { %vm237_vm4 = vcmp.eq.s32.totalorder %v927_v36, 0  ;;  %vm262_vm5 = vcmp.eq.s32.totalorder %v927_v36, 127  ;;  %v316_v9 = vmul.f32 4.0, %v819_v38  ;;  %v315_v11 = vmul.f32 4.0, %v829_v45 }
  0x50   : > { %265 = vrot.lane.b32.xlu1 %v809_v31, %s629_s27  ;;  %v317_v29 = vmul.f32 4.0, %v848_v53 }
  0x51   : > { %263 = vrot.lane.b32.xlu0 %v785_v19, %s629_s27 }
  0x54   : > { %269 = vrot.lane.b32.xlu1 %v797_v24, %s629_s27 }
  0x55   : > { %267 = vrot.lane.b32.xlu0 %v775_v14, %s629_s27 }
  0x58   : > { %273 = vrot.lane.b32.xlu1 %v819_v38, %s629_s27 }
  0x59   : > { %271 = vrot.lane.b32.xlu0 %v829_v45, %s629_s27 }
  0x5c   : > { %277 = vrot.lane.b32.xlu1 %v838_v49, %s629_s27 }
  0x5d   : > { %275 = vrot.lane.b32.xlu0 %v848_v53, %s629_s27 }
  0xb0   : > { %v243_v1 = vpop.permute.xlu1 %242 }
  0xb1   : > { %v256_v54 = vsel %vm237_vm4, 0.0, %v243_v1 }
  0xb2   : > { %v297_v19 = vadd.f32 %v856_v57, %v256_v54 }
  0xb3   : > { %v239_v5 = vpop.permute.xlu0 %238 }
  0xb4   : > { %v254_v43 = vsel %vm237_vm4, 0.0, %v239_v5 }
  0xb5   : > { %v295_v0 = vadd.f32 %v287_v61, %v254_v43 }
  0xb6   : > { %v245_v34 = vpop.permute.xlu1 %244 }
  0xb7   : > { %v241_v35 = vpop.permute.xlu0 %240  ;;  %v257_v48 = vsel %vm237_vm4, 0.0, %v245_v34 }
  0xb8   : > { %v255_v41 = vsel %vm237_vm4, 0.0, %v241_v35  ;;  %v298_v58 = vadd.f32 %v871_v3, %v257_v48 }
  0xb9   : > { %v296_v44 = vadd.f32 %v288_v8, %v255_v41 }
  0xba   : > { %v249_v37 = vpop.permute.xlu1 %248 }
  0xbb   : > { %v247_v39 = vpop.permute.xlu0 %246  ;;  %v259_v63 = vsel %vm237_vm4, 0.0, %v249_v37 }
  0xbc   : > { %v258_v7 = vsel %vm237_vm4, 0.0, %v247_v39  ;;  %v300_v57 = vadd.f32 %v292_v27, %v259_v63 }
  0xbd   : > { %v299_v12 = vadd.f32 %v900_v23, %v258_v7  ;;  %v318_v23 = vmul.f32 4.0, %v838_v49 }
  0xbe   : > { %v253_v40 = vpop.permute.xlu1 %252 }
  0xbf   : > { %v251_v42 = vpop.permute.xlu0 %250  ;;  %v261_v13 = vsel %vm237_vm4, 0.0, %v253_v40 }
  0xc0   : > { %v260_v18 = vsel %vm237_vm4, 0.0, %v251_v42  ;;  %v302_v21 = vadd.f32 %v914_v32, %v261_v13 }
  0xc1   : > { %v301_v26 = vadd.f32 %v916_v33, %v260_v18 }
  0xc2   : > { %v266_v46 = vpop.permute.xlu1 %265 }
  0xc3   : > { %v280_v50 = vsel %vm262_vm5, 0.0, %v266_v46  ;;  %v264_v51 = vpop.permute.xlu0 %263 }
  0xc4   : > { %v304_v55 = vadd.f32 %v296_v44, %v280_v50  ;;  %v279_v56 = vsel %vm262_vm5, 0.0, %v264_v51 }
  0xc5   : > { %v303_v31 = vadd.f32 %v295_v0, %v279_v56 }
  0xc6   : > { %v320_v59 = vsub.f32 %v304_v55, %v312_v47  ;;  %v270_v61 = vpop.permute.xlu1 %269 }
  0xc7   : > { %v319_v2 = vsub.f32 %v303_v31, %v311_v52  ;;  %v282_v4 = vsel %vm262_vm5, 0.0, %v270_v61  ;;  %v268_v6 = vpop.permute.xlu0 %267 }
  0xc8   : > { %457 = vst [vmem:[%s761_s16 + $0x38] sm:$0xff] %v320_v59  ;;  %v306_v3 = vadd.f32 %v298_v58, %v282_v4  ;;  %v281_v24 = vsel %vm262_vm5, 0.0, %v268_v6 }
  0xc9   : > { %456 = vst [vmem:[%s761_s16 + $0x30] sm:$0xff] %v319_v2  ;;  %v305_v14 = vadd.f32 %v297_v19, %v281_v24 }
  0xca   : > { %v322_v8 = vsub.f32 %v306_v3, %v314_v60  ;;  %v274_v10 = vpop.permute.xlu1 %273 }
  0xcb   : > { %v321_v15 = vsub.f32 %v305_v14, %v313_v62  ;;  %v284_v16 = vsel %vm262_vm5, 0.0, %v274_v10  ;;  %v272_v17 = vpop.permute.xlu0 %271 }
  0xcc   : > { %459 = vst [vmem:[%s761_s16 + $0x78] sm:$0xff] %v322_v8  ;;  %v308_v38 = vadd.f32 %v300_v57, %v284_v16  ;;  %v283_v45 = vsel %vm262_vm5, 0.0, %v272_v17 }
  0xcd   : > { %458 = vst [vmem:[%s761_s16 + $0x70] sm:$0xff] %v321_v15  ;;  %v307_v20 = vadd.f32 %v299_v12, %v283_v45 }
  0xce   : > { %v324_v22 = vsub.f32 %v308_v38, %v316_v9  ;;  %v278_v25 = vpop.permute.xlu1 %277 }
  0xcf   : > { %v323_v27 = vsub.f32 %v307_v20, %v315_v11  ;;  %v286_v28 = vsel %vm262_vm5, 0.0, %v278_v25  ;;  %v276_v30 = vpop.permute.xlu0 %275 }
  0xd0   : > { %461 = vst [vmem:[%s761_s16 + $0xb8] sm:$0xff] %v324_v22  ;;  %v310_v32 = vadd.f32 %v302_v21, %v286_v28  ;;  %v285_v49 = vsel %vm262_vm5, 0.0, %v276_v30 }
  0xd1   : > { %460 = vst [vmem:[%s761_s16 + $0xb0] sm:$0xff] %v323_v27  ;;  %v309_v33 = vadd.f32 %v301_v26, %v285_v49 }
  0xd2   : > { %v326_v1 = vsub.f32 %v310_v32, %v318_v23 }
  0xd3   : > { %v325_v53 = vsub.f32 %v309_v33, %v317_v29 }
  0xd4   : > { %463 = vst [vmem:[%s761_s16 + $0xf8] sm:$0xff] %v326_v1 }
  0xd5   : > { %462 = vst [vmem:[%s761_s16 + $0xf0] sm:$0xff] %v325_v53 }
  0xd6   : > { %570 = shalt.err (!%p567_p2)
}
  0xd7   : > { %s571_s19 = scalar_lea.hbm %s987_s4, 4096  ;;  %s575_s23 = scalar_lea.hbm %s1036_s1, 8192 }
  0xd8   : > { %p572_p4 = scmp.ne.s32.totalorder %s987_s4, %s571_s19  ;;  %p576_p9 = scmp.lt.u32.totalorder %s987_s4, %s1036_s1 }
  0xd9   : > { %p577_p1 = scmp.lt.u32.totalorder %s575_s23, %s571_s19  ;;  %p579_p6 = scmp.lt.u32.totalorder %s571_s19, %s987_s4 }
  0xda   : > { %p573_p5 = pnand %p572_p4, %p1042_p11 }
  0xdb   : > { %p578_p3 = por %p577_p1, %p576_p9 }
  0xdc   : > { %p574_p7 = pneg %p573_p5 }
  0xdd   : > { %p580_p12 = por %p579_p6, %p578_p3 }
  0xdf   : > { %p581_p13 = pnand %p580_p12, %p574_p7 }
  0xe1   : > { %584 = shalt.err (!%p581_p13)
}
  0xe2   : > { %s631_s24 = smov 128   ;;  %s632_s16 = smov 8  }
  0xe3   : > { %477 = dma.vmem_to_hbm [thread:$0]  (%p1042_p11), %s989_s30, 4096, %s987_s4, %s361_s10, %s631_s24, %s631_s24, %s632_s16  }
  0xe4 PF: > { %s390_s25 = sand.u32 1, %s611_s6   ;;  %p1043_p8 = scmp.ne.s32.totalorder %s1040_s18, 0 }
  0xe5   : > { %p1044_p10 = scmp.ge.s32.totalorder %s623_s9, 2  ;;  %s391_s27 = scalar_lea.sflag [#allocation4], %s390_s25 }
  0xe7   : > { %p484_p0 = pnand %p1044_p10, %p1043_p8 }
  0xe9   : > { %606 = dma.done.wait (!%p484_p0), %s391_s27, 4096  }
  0xea   : > { %608 = vsyncadd (!%p484_p0), %s391_s27, 4294963200  ;;  %p14_p2 = scmp.ge.s32.totalorder %s668_s12, 4   ;;  %s1045_s6 = smov %s615_s7 }
  0xeb   : > { %s1046_s7 = smov %s619_s8  ;;  %s1047_s8 = smov %s680_s15 }
  0xec   : > { %s1048_s9 = smov %s668_s12  ;;  %16 = sbr.rel (!%p14_p2) target bundleno = 5 (0x5), region = 70 }
  0xf3   :  { %396 = vsyncpa [#allocation3], 1 }
  0xf4   :  { %398 = vsyncpa [#allocation3 + $0x1], 1 }
  0xf5   :  { %399 = vsyncpa [#allocation4], 1 }
  0xf6   :  { %401 = vsyncpa [#allocation4 + $0x1], 1 }

</bundles_post_ra>
